<compile_context>
chip_gen: v7x
topology: tpu7x:2x2x1
jax: 0.10.0
libtpu: 0.0.40
codegen_flags: <defaults>
</compile_context>

<pallas_src>
import jax
import jax.numpy as jnp
from jax.experimental import pallas as pl
from jax.experimental.pallas import tpu as pltpu


# --------------------------------------------------------------------------
# Fused forward kernel (one invocation per batch element)
# --------------------------------------------------------------------------

def _decoder_conv_kernel(x_ref, w1_ref, b1_ref,
                         w2_ref, b2_ref, s2_ref,
                         w3_ref, b3_ref, s3_ref,
                         w4_ref, b4_ref, o_ref):
    f32 = jnp.float32
    x = x_ref[...]                                            # [L, Cin]

    # conv1: ConvTranspose1d k=1 s=1  == pointwise dense, then ReLU.
    h = jnp.dot(x, w1_ref[...], preferred_element_type=f32) + b1_ref[...]
    h = jnp.maximum(h, 0.0)

    def conv_transpose_k4_s2(h, w_ref, b_ref, s_ref):
        # h: [Lin, Cin]; w_ref: [4, Cin, Cout]; s_ref: [4, Lout, Lin]
        # out[j] = sum_{i,k : j = 2*i + k} h[i] @ W_k   (k = 0..3)
        lout = s_ref.shape[1]
        cout = w_ref.shape[2]
        y = jnp.zeros((lout, cout), f32)
        for k in range(4):                                     # unrolled, static
            tap = jnp.dot(h, w_ref[k], preferred_element_type=f32)   # [Lin, Cout]
            y = y + jnp.dot(s_ref[k], tap, preferred_element_type=f32)
        return y + b_ref[...]

    # conv2 / conv3: ConvTranspose1d k=4 s=2, each followed by ReLU.
    h = jnp.maximum(conv_transpose_k4_s2(h, w2_ref, b2_ref, s2_ref), 0.0)
    h = jnp.maximum(conv_transpose_k4_s2(h, w3_ref, b3_ref, s3_ref), 0.0)

    # conv4: ConvTranspose1d k=1 s=1 (no activation).
    o_ref[...] = jnp.dot(h, w4_ref[...], preferred_element_type=f32) + b4_ref[...]


def _make_scatter(lin, kernel=4, stride=2):
    # S[k, j, i] = 1  iff  j == stride*i + k      (shape [kernel, Lout, Lin])
    lout = (lin - 1) * stride + kernel
    j = jnp.arange(lout, dtype=jnp.int32)[None, :, None]
    i = jnp.arange(lin, dtype=jnp.int32)[None, None, :]
    k = jnp.arange(kernel, dtype=jnp.int32)[:, None, None]
    return (j == stride * i + k).astype(jnp.float32)


def decoder_conv_forward(params, x):
    """x: [N, in_dim, L] (PyTorch NCL layout) -> [N, out_dim, L_out]."""
    N, cin, L = x.shape
    w1 = params["w1"][:, :, 0]                                # [Cin, H]
    b1 = params["b1"].reshape(1, -1)
    w2 = jnp.transpose(params["w2"], (2, 0, 1))               # [4, H, H/2]
    b2 = params["b2"].reshape(1, -1)
    w3 = jnp.transpose(params["w3"], (2, 0, 1))               # [4, H/2, H/4]
    b3 = params["b3"].reshape(1, -1)
    w4 = params["w4"][:, :, 0]                                # [H/4, out]
    b4 = params["b4"].reshape(1, -1)

    H, H2, H3, Dout = w1.shape[1], w2.shape[2], w3.shape[2], w4.shape[1]
    L2 = 2 * L + 2
    L3 = 2 * L2 + 2

    s2 = _make_scatter(L)                                     # [4, L2, L]
    s3 = _make_scatter(L2)                                    # [4, L3, L2]

    x_t = jnp.transpose(x, (0, 2, 1))                         # [N, L, Cin] channels->lanes

    out = pl.pallas_call(
        _decoder_conv_kernel,
        out_shape=jax.ShapeDtypeStruct((N, L3, Dout), jnp.float32),
        grid=(N,),
        in_specs=[
            pl.BlockSpec((None, L, cin), lambda n: (n, 0, 0)),
            pl.BlockSpec((cin, H), lambda n: (0, 0)),
            pl.BlockSpec((1, H), lambda n: (0, 0)),
            pl.BlockSpec((4, H, H2), lambda n: (0, 0, 0)),
            pl.BlockSpec((1, H2), lambda n: (0, 0)),
            pl.BlockSpec((4, L2, L), lambda n: (0, 0, 0)),
            pl.BlockSpec((4, H2, H3), lambda n: (0, 0, 0)),
            pl.BlockSpec((1, H3), lambda n: (0, 0)),
            pl.BlockSpec((4, L3, L2), lambda n: (0, 0, 0)),
            pl.BlockSpec((H3, Dout), lambda n: (0, 0)),
            pl.BlockSpec((1, Dout), lambda n: (0, 0)),
        ],
        out_specs=pl.BlockSpec((None, L3, Dout), lambda n: (n, 0, 0)),
        compiler_params=pltpu.CompilerParams(dimension_semantics=("parallel",)),
    )(x_t, w1, b1, w2, b2, s2, w3, b3, s3, w4, b4)

    return jnp.transpose(out, (0, 2, 1))                      # [N, out_dim, L_out]


# --------------------------------------------------------------------------
# Pure-JAX reference (for correctness check) and parameter init
# --------------------------------------------------------------------------

def _convtranspose1d_ref(x, w, b, stride):
    # x: [N, Cin, L]; w (PyTorch layout): [Cin, Cout, K]; b: [Cout]
    N, _, L = x.shape
    _, cout, K = w.shape
    lout = (L - 1) * stride + K
    y = jnp.zeros((N, cout, lout), jnp.float32)
    for k in range(K):
        contrib = jnp.einsum('ncl,cd->ndl', x, w[:, :, k])
        y = y.at[:, :, k:k + (L - 1) * stride + 1:stride].add(contrib)
    return y + b[None, :, None]


def decoder_conv_ref(params, x):
    h = jax.nn.relu(_convtranspose1d_ref(x, params["w1"], params["b1"], 1))
    h = jax.nn.relu(_convtranspose1d_ref(h, params["w2"], params["b2"], 2))
    h = jax.nn.relu(_convtranspose1d_ref(h, params["w3"], params["b3"], 2))
    return _convtranspose1d_ref(h, params["w4"], params["b4"], 1)


def init_params(key, in_dim, h_dim, out_dim):
    ks = jax.random.split(key, 8)

    def u(k, shape, fan_in):
        bound = 1.0 / (fan_in ** 0.5)
        return jax.random.uniform(k, shape, jnp.float32, -bound, bound)

    h2, h4 = h_dim // 2, h_dim // 4
    return {
        # ConvTranspose1d weight layout: [in_channels, out_channels, kernel]
        "w1": u(ks[0], (in_dim, h_dim, 1), in_dim),
        "b1": u(ks[1], (h_dim,), in_dim),
        "w2": u(ks[2], (h_dim, h2, 4), h_dim * 4),
        "b2": u(ks[3], (h2,), h_dim * 4),
        "w3": u(ks[4], (h2, h4, 4), h2 * 4),
        "b3": u(ks[5], (h4,), h2 * 4),
        "w4": u(ks[6], (h4, out_dim, 1), h4),
        "b4": u(ks[7], (out_dim,), h4),
    }


# --------------------------------------------------------------------------

if __name__ == "__main__":
    in_dim, h_dim, out_dim = 32, 32, 12          # Decoder_conv(out_dim, in_dim, h_dim, ...)
    N, L = 2, 8                                  # input latent: [N, in_dim, L]

    key = jax.random.PRNGKey(0)
    pkey, xkey = jax.random.split(key)
    params = init_params(pkey, in_dim, h_dim, out_dim)
    x = jax.random.normal(xkey, (N, in_dim, L), jnp.float32)

    fwd = jax.jit(decoder_conv_forward)
    y = fwd(params, x)
    jax.block_until_ready(y)

    L_out = 2 * (2 * L + 2) + 2                  # 8 -> 18 -> 38
    assert y.shape == (N, out_dim, L_out), y.shape

    y_ref = decoder_conv_ref(params, x)
    assert jnp.allclose(y, y_ref, atol=1e-4, rtol=1e-4), \
        float(jnp.max(jnp.abs(y - y_ref)))

    print("KERNEL_OK")
</pallas_src>

<mosaic_0001>
module attributes {stable_mosaic.version = 11 : i64} {
  func.func @_decoder_conv_kernel(%arg0: i32, %arg1: memref<1x8x32xf32, #tpu.memory_space<vmem>>, %arg2: memref<32x32xf32, #tpu.memory_space<vmem>>, %arg3: memref<1x32xf32, #tpu.memory_space<vmem>>, %arg4: memref<4x32x16xf32, #tpu.memory_space<vmem>>, %arg5: memref<1x16xf32, #tpu.memory_space<vmem>>, %arg6: memref<4x18x8xf32, #tpu.memory_space<vmem>>, %arg7: memref<4x16x8xf32, #tpu.memory_space<vmem>>, %arg8: memref<1x8xf32, #tpu.memory_space<vmem>>, %arg9: memref<4x38x18xf32, #tpu.memory_space<vmem>>, %arg10: memref<8x12xf32, #tpu.memory_space<vmem>>, %arg11: memref<1x12xf32, #tpu.memory_space<vmem>>, %arg12: memref<1x38x12xf32, #tpu.memory_space<vmem>>) attributes {dimension_semantics = [#tpu.dimension_semantics<parallel>], iteration_bounds = array<i64: 2>, scalar_prefetch = 0 : i64, scratch_operands = 0 : i64, tpu.core_type = #tpu.core_type<tc>, window_params = [{transform_indices = @transform_0, window_bounds = array<i64: 1, 8, 32>}, {pipeline_mode = #tpu.pipeline_mode<synchronous>, transform_indices = @transform_1, window_bounds = array<i64: 32, 32>}, {pipeline_mode = #tpu.pipeline_mode<synchronous>, transform_indices = @transform_2, window_bounds = array<i64: 1, 32>}, {pipeline_mode = #tpu.pipeline_mode<synchronous>, transform_indices = @transform_3, window_bounds = array<i64: 4, 32, 16>}, {pipeline_mode = #tpu.pipeline_mode<synchronous>, transform_indices = @transform_4, window_bounds = array<i64: 1, 16>}, {pipeline_mode = #tpu.pipeline_mode<synchronous>, transform_indices = @transform_5, window_bounds = array<i64: 4, 18, 8>}, {pipeline_mode = #tpu.pipeline_mode<synchronous>, transform_indices = @transform_6, window_bounds = array<i64: 4, 16, 8>}, {pipeline_mode = #tpu.pipeline_mode<synchronous>, transform_indices = @transform_7, window_bounds = array<i64: 1, 8>}, {pipeline_mode = #tpu.pipeline_mode<synchronous>, transform_indices = @transform_8, window_bounds = array<i64: 4, 38, 18>}, {pipeline_mode = #tpu.pipeline_mode<synchronous>, transform_indices = @transform_9, window_bounds = array<i64: 8, 12>}, {pipeline_mode = #tpu.pipeline_mode<synchronous>, transform_indices = @transform_10, window_bounds = array<i64: 1, 12>}, {transform_indices = @transform_11, window_bounds = array<i64: 1, 38, 12>}]} {
    %c0 = arith.constant 0 : index
    %c0_0 = arith.constant 0 : index
    %c0_1 = arith.constant 0 : index
    %0 = vector.load %arg1[%c0, %c0_0, %c0_1] : memref<1x8x32xf32, #tpu.memory_space<vmem>>, vector<1x8x32xf32>
    %1 = vector.shape_cast %0 : vector<1x8x32xf32> to vector<8x32xf32>
    %c0_2 = arith.constant 0 : index
    %c0_3 = arith.constant 0 : index
    %2 = vector.load %arg2[%c0_2, %c0_3] : memref<32x32xf32, #tpu.memory_space<vmem>>, vector<32x32xf32>
    %cst = arith.constant dense<0.000000e+00> : vector<8x32xf32>
    %3 = tpu.matmul %1, %2, %cst {dimension_numbers = #tpu.dot_dimension_numbers<[1], [0], [0], [1], [0, 0, 1, 1], [], []>} : vector<8x32xf32>, vector<32x32xf32>, vector<8x32xf32> -> vector<8x32xf32>
    %c0_4 = arith.constant 0 : index
    %c0_5 = arith.constant 0 : index
    %4 = vector.load %arg3[%c0_4, %c0_5] : memref<1x32xf32, #tpu.memory_space<vmem>>, vector<1x32xf32>
    %5 = vector.broadcast %4 : vector<1x32xf32> to vector<8x32xf32>
    %6 = arith.addf %3, %5 : vector<8x32xf32>
    %cst_6 = arith.constant 0.000000e+00 : f32
    %7 = vector.broadcast %cst_6 : f32 to vector<8x32xf32>
    %8 = arith.maximumf %6, %7 : vector<8x32xf32>
    %cst_7 = arith.constant 0.000000e+00 : f32
    %9 = vector.broadcast %cst_7 : f32 to vector<18x16xf32>
    %c0_8 = arith.constant 0 : index
    %c0_9 = arith.constant 0 : index
    %c0_10 = arith.constant 0 : index
    %10 = vector.load %arg4[%c0_8, %c0_9, %c0_10] : memref<4x32x16xf32, #tpu.memory_space<vmem>>, vector<1x32x16xf32>
    %11 = vector.shape_cast %10 : vector<1x32x16xf32> to vector<32x16xf32>
    %cst_11 = arith.constant dense<0.000000e+00> : vector<8x16xf32>
    %12 = tpu.matmul %8, %11, %cst_11 {dimension_numbers = #tpu.dot_dimension_numbers<[1], [0], [0], [1], [0, 0, 1, 1], [], []>} : vector<8x32xf32>, vector<32x16xf32>, vector<8x16xf32> -> vector<8x16xf32>
    %c0_12 = arith.constant 0 : index
    %c0_13 = arith.constant 0 : index
    %c0_14 = arith.constant 0 : index
    %13 = vector.load %arg6[%c0_12, %c0_13, %c0_14] : memref<4x18x8xf32, #tpu.memory_space<vmem>>, vector<1x18x8xf32>
    %14 = vector.shape_cast %13 : vector<1x18x8xf32> to vector<18x8xf32>
    %cst_15 = arith.constant dense<0.000000e+00> : vector<18x16xf32>
    %15 = tpu.matmul %14, %12, %cst_15 {dimension_numbers = #tpu.dot_dimension_numbers<[1], [0], [0], [1], [0, 0, 1, 1], [], []>} : vector<18x8xf32>, vector<8x16xf32>, vector<18x16xf32> -> vector<18x16xf32>
    %16 = arith.addf %9, %15 : vector<18x16xf32>
    %c1 = arith.constant 1 : index
    %c0_16 = arith.constant 0 : index
    %c0_17 = arith.constant 0 : index
    %17 = vector.load %arg4[%c1, %c0_16, %c0_17] : memref<4x32x16xf32, #tpu.memory_space<vmem>>, vector<1x32x16xf32>
    %18 = vector.shape_cast %17 : vector<1x32x16xf32> to vector<32x16xf32>
    %cst_18 = arith.constant dense<0.000000e+00> : vector<8x16xf32>
    %19 = tpu.matmul %8, %18, %cst_18 {dimension_numbers = #tpu.dot_dimension_numbers<[1], [0], [0], [1], [0, 0, 1, 1], [], []>} : vector<8x32xf32>, vector<32x16xf32>, vector<8x16xf32> -> vector<8x16xf32>
    %c1_19 = arith.constant 1 : index
    %c0_20 = arith.constant 0 : index
    %c0_21 = arith.constant 0 : index
    %20 = vector.load %arg6[%c1_19, %c0_20, %c0_21] : memref<4x18x8xf32, #tpu.memory_space<vmem>>, vector<1x18x8xf32>
    %21 = vector.shape_cast %20 : vector<1x18x8xf32> to vector<18x8xf32>
    %cst_22 = arith.constant dense<0.000000e+00> : vector<18x16xf32>
    %22 = tpu.matmul %21, %19, %cst_22 {dimension_numbers = #tpu.dot_dimension_numbers<[1], [0], [0], [1], [0, 0, 1, 1], [], []>} : vector<18x8xf32>, vector<8x16xf32>, vector<18x16xf32> -> vector<18x16xf32>
    %23 = arith.addf %16, %22 : vector<18x16xf32>
    %c2 = arith.constant 2 : index
    %c0_23 = arith.constant 0 : index
    %c0_24 = arith.constant 0 : index
    %24 = vector.load %arg4[%c2, %c0_23, %c0_24] : memref<4x32x16xf32, #tpu.memory_space<vmem>>, vector<1x32x16xf32>
    %25 = vector.shape_cast %24 : vector<1x32x16xf32> to vector<32x16xf32>
    %cst_25 = arith.constant dense<0.000000e+00> : vector<8x16xf32>
    %26 = tpu.matmul %8, %25, %cst_25 {dimension_numbers = #tpu.dot_dimension_numbers<[1], [0], [0], [1], [0, 0, 1, 1], [], []>} : vector<8x32xf32>, vector<32x16xf32>, vector<8x16xf32> -> vector<8x16xf32>
    %c2_26 = arith.constant 2 : index
    %c0_27 = arith.constant 0 : index
    %c0_28 = arith.constant 0 : index
    %27 = vector.load %arg6[%c2_26, %c0_27, %c0_28] : memref<4x18x8xf32, #tpu.memory_space<vmem>>, vector<1x18x8xf32>
    %28 = vector.shape_cast %27 : vector<1x18x8xf32> to vector<18x8xf32>
    %cst_29 = arith.constant dense<0.000000e+00> : vector<18x16xf32>
    %29 = tpu.matmul %28, %26, %cst_29 {dimension_numbers = #tpu.dot_dimension_numbers<[1], [0], [0], [1], [0, 0, 1, 1], [], []>} : vector<18x8xf32>, vector<8x16xf32>, vector<18x16xf32> -> vector<18x16xf32>
    %30 = arith.addf %23, %29 : vector<18x16xf32>
    %c3 = arith.constant 3 : index
    %c0_30 = arith.constant 0 : index
    %c0_31 = arith.constant 0 : index
    %31 = vector.load %arg4[%c3, %c0_30, %c0_31] : memref<4x32x16xf32, #tpu.memory_space<vmem>>, vector<1x32x16xf32>
    %32 = vector.shape_cast %31 : vector<1x32x16xf32> to vector<32x16xf32>
    %cst_32 = arith.constant dense<0.000000e+00> : vector<8x16xf32>
    %33 = tpu.matmul %8, %32, %cst_32 {dimension_numbers = #tpu.dot_dimension_numbers<[1], [0], [0], [1], [0, 0, 1, 1], [], []>} : vector<8x32xf32>, vector<32x16xf32>, vector<8x16xf32> -> vector<8x16xf32>
    %c3_33 = arith.constant 3 : index
    %c0_34 = arith.constant 0 : index
    %c0_35 = arith.constant 0 : index
    %34 = vector.load %arg6[%c3_33, %c0_34, %c0_35] : memref<4x18x8xf32, #tpu.memory_space<vmem>>, vector<1x18x8xf32>
    %35 = vector.shape_cast %34 : vector<1x18x8xf32> to vector<18x8xf32>
    %cst_36 = arith.constant dense<0.000000e+00> : vector<18x16xf32>
    %36 = tpu.matmul %35, %33, %cst_36 {dimension_numbers = #tpu.dot_dimension_numbers<[1], [0], [0], [1], [0, 0, 1, 1], [], []>} : vector<18x8xf32>, vector<8x16xf32>, vector<18x16xf32> -> vector<18x16xf32>
    %37 = arith.addf %30, %36 : vector<18x16xf32>
    %c0_37 = arith.constant 0 : index
    %c0_38 = arith.constant 0 : index
    %38 = vector.load %arg5[%c0_37, %c0_38] : memref<1x16xf32, #tpu.memory_space<vmem>>, vector<1x16xf32>
    %39 = vector.broadcast %38 : vector<1x16xf32> to vector<18x16xf32>
    %40 = arith.addf %37, %39 : vector<18x16xf32>
    %cst_39 = arith.constant 0.000000e+00 : f32
    %41 = vector.broadcast %cst_39 : f32 to vector<18x16xf32>
    %42 = arith.maximumf %40, %41 : vector<18x16xf32>
    %cst_40 = arith.constant 0.000000e+00 : f32
    %43 = vector.broadcast %cst_40 : f32 to vector<38x8xf32>
    %c0_41 = arith.constant 0 : index
    %c0_42 = arith.constant 0 : index
    %c0_43 = arith.constant 0 : index
    %44 = vector.load %arg7[%c0_41, %c0_42, %c0_43] : memref<4x16x8xf32, #tpu.memory_space<vmem>>, vector<1x16x8xf32>
    %45 = vector.shape_cast %44 : vector<1x16x8xf32> to vector<16x8xf32>
    %cst_44 = arith.constant dense<0.000000e+00> : vector<18x8xf32>
    %46 = tpu.matmul %42, %45, %cst_44 {dimension_numbers = #tpu.dot_dimension_numbers<[1], [0], [0], [1], [0, 0, 1, 1], [], []>} : vector<18x16xf32>, vector<16x8xf32>, vector<18x8xf32> -> vector<18x8xf32>
    %c0_45 = arith.constant 0 : index
    %c0_46 = arith.constant 0 : index
    %c0_47 = arith.constant 0 : index
    %47 = vector.load %arg9[%c0_45, %c0_46, %c0_47] : memref<4x38x18xf32, #tpu.memory_space<vmem>>, vector<1x38x18xf32>
    %48 = vector.shape_cast %47 : vector<1x38x18xf32> to vector<38x18xf32>
    %cst_48 = arith.constant dense<0.000000e+00> : vector<38x8xf32>
    %49 = tpu.matmul %48, %46, %cst_48 {dimension_numbers = #tpu.dot_dimension_numbers<[1], [0], [0], [1], [0, 0, 1, 1], [], []>} : vector<38x18xf32>, vector<18x8xf32>, vector<38x8xf32> -> vector<38x8xf32>
    %50 = arith.addf %43, %49 : vector<38x8xf32>
    %c1_49 = arith.constant 1 : index
    %c0_50 = arith.constant 0 : index
    %c0_51 = arith.constant 0 : index
    %51 = vector.load %arg7[%c1_49, %c0_50, %c0_51] : memref<4x16x8xf32, #tpu.memory_space<vmem>>, vector<1x16x8xf32>
    %52 = vector.shape_cast %51 : vector<1x16x8xf32> to vector<16x8xf32>
    %cst_52 = arith.constant dense<0.000000e+00> : vector<18x8xf32>
    %53 = tpu.matmul %42, %52, %cst_52 {dimension_numbers = #tpu.dot_dimension_numbers<[1], [0], [0], [1], [0, 0, 1, 1], [], []>} : vector<18x16xf32>, vector<16x8xf32>, vector<18x8xf32> -> vector<18x8xf32>
    %c1_53 = arith.constant 1 : index
    %c0_54 = arith.constant 0 : index
    %c0_55 = arith.constant 0 : index
    %54 = vector.load %arg9[%c1_53, %c0_54, %c0_55] : memref<4x38x18xf32, #tpu.memory_space<vmem>>, vector<1x38x18xf32>
    %55 = vector.shape_cast %54 : vector<1x38x18xf32> to vector<38x18xf32>
    %cst_56 = arith.constant dense<0.000000e+00> : vector<38x8xf32>
    %56 = tpu.matmul %55, %53, %cst_56 {dimension_numbers = #tpu.dot_dimension_numbers<[1], [0], [0], [1], [0, 0, 1, 1], [], []>} : vector<38x18xf32>, vector<18x8xf32>, vector<38x8xf32> -> vector<38x8xf32>
    %57 = arith.addf %50, %56 : vector<38x8xf32>
    %c2_57 = arith.constant 2 : index
    %c0_58 = arith.constant 0 : index
    %c0_59 = arith.constant 0 : index
    %58 = vector.load %arg7[%c2_57, %c0_58, %c0_59] : memref<4x16x8xf32, #tpu.memory_space<vmem>>, vector<1x16x8xf32>
    %59 = vector.shape_cast %58 : vector<1x16x8xf32> to vector<16x8xf32>
    %cst_60 = arith.constant dense<0.000000e+00> : vector<18x8xf32>
    %60 = tpu.matmul %42, %59, %cst_60 {dimension_numbers = #tpu.dot_dimension_numbers<[1], [0], [0], [1], [0, 0, 1, 1], [], []>} : vector<18x16xf32>, vector<16x8xf32>, vector<18x8xf32> -> vector<18x8xf32>
    %c2_61 = arith.constant 2 : index
    %c0_62 = arith.constant 0 : index
    %c0_63 = arith.constant 0 : index
    %61 = vector.load %arg9[%c2_61, %c0_62, %c0_63] : memref<4x38x18xf32, #tpu.memory_space<vmem>>, vector<1x38x18xf32>
    %62 = vector.shape_cast %61 : vector<1x38x18xf32> to vector<38x18xf32>
    %cst_64 = arith.constant dense<0.000000e+00> : vector<38x8xf32>
    %63 = tpu.matmul %62, %60, %cst_64 {dimension_numbers = #tpu.dot_dimension_numbers<[1], [0], [0], [1], [0, 0, 1, 1], [], []>} : vector<38x18xf32>, vector<18x8xf32>, vector<38x8xf32> -> vector<38x8xf32>
    %64 = arith.addf %57, %63 : vector<38x8xf32>
    %c3_65 = arith.constant 3 : index
    %c0_66 = arith.constant 0 : index
    %c0_67 = arith.constant 0 : index
    %65 = vector.load %arg7[%c3_65, %c0_66, %c0_67] : memref<4x16x8xf32, #tpu.memory_space<vmem>>, vector<1x16x8xf32>
    %66 = vector.shape_cast %65 : vector<1x16x8xf32> to vector<16x8xf32>
    %cst_68 = arith.constant dense<0.000000e+00> : vector<18x8xf32>
    %67 = tpu.matmul %42, %66, %cst_68 {dimension_numbers = #tpu.dot_dimension_numbers<[1], [0], [0], [1], [0, 0, 1, 1], [], []>} : vector<18x16xf32>, vector<16x8xf32>, vector<18x8xf32> -> vector<18x8xf32>
    %c3_69 = arith.constant 3 : index
    %c0_70 = arith.constant 0 : index
    %c0_71 = arith.constant 0 : index
    %68 = vector.load %arg9[%c3_69, %c0_70, %c0_71] : memref<4x38x18xf32, #tpu.memory_space<vmem>>, vector<1x38x18xf32>
    %69 = vector.shape_cast %68 : vector<1x38x18xf32> to vector<38x18xf32>
    %cst_72 = arith.constant dense<0.000000e+00> : vector<38x8xf32>
    %70 = tpu.matmul %69, %67, %cst_72 {dimension_numbers = #tpu.dot_dimension_numbers<[1], [0], [0], [1], [0, 0, 1, 1], [], []>} : vector<38x18xf32>, vector<18x8xf32>, vector<38x8xf32> -> vector<38x8xf32>
    %71 = arith.addf %64, %70 : vector<38x8xf32>
    %c0_73 = arith.constant 0 : index
    %c0_74 = arith.constant 0 : index
    %72 = vector.load %arg8[%c0_73, %c0_74] : memref<1x8xf32, #tpu.memory_space<vmem>>, vector<1x8xf32>
    %73 = vector.broadcast %72 : vector<1x8xf32> to vector<38x8xf32>
    %74 = arith.addf %71, %73 : vector<38x8xf32>
    %cst_75 = arith.constant 0.000000e+00 : f32
    %75 = vector.broadcast %cst_75 : f32 to vector<38x8xf32>
    %76 = arith.maximumf %74, %75 : vector<38x8xf32>
    %c0_76 = arith.constant 0 : index
    %c0_77 = arith.constant 0 : index
    %77 = vector.load %arg10[%c0_76, %c0_77] : memref<8x12xf32, #tpu.memory_space<vmem>>, vector<8x12xf32>
    %cst_78 = arith.constant dense<0.000000e+00> : vector<38x12xf32>
    %78 = tpu.matmul %76, %77, %cst_78 {dimension_numbers = #tpu.dot_dimension_numbers<[1], [0], [0], [1], [0, 0, 1, 1], [], []>} : vector<38x8xf32>, vector<8x12xf32>, vector<38x12xf32> -> vector<38x12xf32>
    %c0_79 = arith.constant 0 : index
    %c0_80 = arith.constant 0 : index
    %79 = vector.load %arg11[%c0_79, %c0_80] : memref<1x12xf32, #tpu.memory_space<vmem>>, vector<1x12xf32>
    %80 = vector.broadcast %79 : vector<1x12xf32> to vector<38x12xf32>
    %81 = arith.addf %78, %80 : vector<38x12xf32>
    %c0_81 = arith.constant 0 : index
    %c0_82 = arith.constant 0 : index
    %c0_83 = arith.constant 0 : index
    %82 = vector.load %arg12[%c0_81, %c0_82, %c0_83] : memref<1x38x12xf32, #tpu.memory_space<vmem>>, vector<1x38x12xf32>
    %83 = vector.shape_cast %82 : vector<1x38x12xf32> to vector<38x12xf32>
    %84 = vector.shape_cast %81 : vector<38x12xf32> to vector<1x38x12xf32>
    tpu.vector_store %arg12[%c0_81, %c0_82, %c0_83], %84 {strides = array<i32>} : memref<1x38x12xf32, #tpu.memory_space<vmem>>, vector<1x38x12xf32>,
    return
  }
  func.func @transform_0(%arg0: i32) -> (i32, i32, i32) {
    %c0_i32 = arith.constant 0 : i32
    %c0_i32_0 = arith.constant 0 : i32
    %c0_i32_1 = arith.constant 0 : i32
    return %arg0, %c0_i32, %c0_i32_0 : i32, i32, i32
  }
  func.func @transform_1(%arg0: i32) -> (i32, i32) {
    %c0_i32 = arith.constant 0 : i32
    %c0_i32_0 = arith.constant 0 : i32
    %c0_i32_1 = arith.constant 0 : i32
    return %c0_i32, %c0_i32_0 : i32, i32
  }
  func.func @transform_2(%arg0: i32) -> (i32, i32) {
    %c0_i32 = arith.constant 0 : i32
    %c0_i32_0 = arith.constant 0 : i32
    %c0_i32_1 = arith.constant 0 : i32
    return %c0_i32, %c0_i32_0 : i32, i32
  }
  func.func @transform_3(%arg0: i32) -> (i32, i32, i32) {
    %c0_i32 = arith.constant 0 : i32
    %c0_i32_0 = arith.constant 0 : i32
    %c0_i32_1 = arith.constant 0 : i32
    %c0_i32_2 = arith.constant 0 : i32
    return %c0_i32, %c0_i32_0, %c0_i32_1 : i32, i32, i32
  }
  func.func @transform_4(%arg0: i32) -> (i32, i32) {
    %c0_i32 = arith.constant 0 : i32
    %c0_i32_0 = arith.constant 0 : i32
    %c0_i32_1 = arith.constant 0 : i32
    return %c0_i32, %c0_i32_0 : i32, i32
  }
  func.func @transform_5(%arg0: i32) -> (i32, i32, i32) {
    %c0_i32 = arith.constant 0 : i32
    %c0_i32_0 = arith.constant 0 : i32
    %c0_i32_1 = arith.constant 0 : i32
    %c0_i32_2 = arith.constant 0 : i32
    return %c0_i32, %c0_i32_0, %c0_i32_1 : i32, i32, i32
  }
  func.func @transform_6(%arg0: i32) -> (i32, i32, i32) {
    %c0_i32 = arith.constant 0 : i32
    %c0_i32_0 = arith.constant 0 : i32
    %c0_i32_1 = arith.constant 0 : i32
    %c0_i32_2 = arith.constant 0 : i32
    return %c0_i32, %c0_i32_0, %c0_i32_1 : i32, i32, i32
  }
  func.func @transform_7(%arg0: i32) -> (i32, i32) {
    %c0_i32 = arith.constant 0 : i32
    %c0_i32_0 = arith.constant 0 : i32
    %c0_i32_1 = arith.constant 0 : i32
    return %c0_i32, %c0_i32_0 : i32, i32
  }
  func.func @transform_8(%arg0: i32) -> (i32, i32, i32) {
    %c0_i32 = arith.constant 0 : i32
    %c0_i32_0 = arith.constant 0 : i32
    %c0_i32_1 = arith.constant 0 : i32
    %c0_i32_2 = arith.constant 0 : i32
    return %c0_i32, %c0_i32_0, %c0_i32_1 : i32, i32, i32
  }
  func.func @transform_9(%arg0: i32) -> (i32, i32) {
    %c0_i32 = arith.constant 0 : i32
    %c0_i32_0 = arith.constant 0 : i32
    %c0_i32_1 = arith.constant 0 : i32
    return %c0_i32, %c0_i32_0 : i32, i32
  }
  func.func @transform_10(%arg0: i32) -> (i32, i32) {
    %c0_i32 = arith.constant 0 : i32
    %c0_i32_0 = arith.constant 0 : i32
    %c0_i32_1 = arith.constant 0 : i32
    return %c0_i32, %c0_i32_0 : i32, i32
  }
  func.func @transform_11(%arg0: i32) -> (i32, i32, i32) {
    %c0_i32 = arith.constant 0 : i32
    %c0_i32_0 = arith.constant 0 : i32
    %c0_i32_1 = arith.constant 0 : i32
    return %arg0, %c0_i32, %c0_i32_0 : i32, i32, i32
  }
}

</mosaic_0001>

<bundles_post_ra>
// kernel: decoder_conv_forward.1
= control target key start
LH: loop header
LB: loop body
LE: loop exit
PB: predicated region body
PF: predicated region fallthrough
CT: control target
= control target key end

     0   :  { %s2765_s17 = smov 0   ;;  %s3207_s0 = inlined_call_operand.vmem [shape: f32[2,8,32], index: 0, kind: input, shape index: {}]   ;;  %s3208_s1 = inlined_call_operand.vmem [shape: f32[32,32], index: 1, kind: input, shape index: {}]   ;;  %s3209_s2 = inlined_call_operand.vmem [shape: f32[1,32], index: 2, kind: input, shape index: {}]   ;;  %s3210_s3 = inlined_call_operand.vmem [shape: f32[4,32,16], index: 3, kind: input, shape index: {}]   ;;  %s3211_s4 = inlined_call_operand.vmem [shape: f32[1,16], index: 4, kind: input, shape index: {}]   ;;  %s3212_s5 = inlined_call_operand.vmem [shape: f32[4,18,8], index: 5, kind: input, shape index: {}]   ;;  %s3213_s6 = inlined_call_operand.vmem [shape: f32[4,16,8], index: 6, kind: input, shape index: {}]   ;;  %s3214_s7 = inlined_call_operand.vmem [shape: f32[1,8], index: 7, kind: input, shape index: {}]   ;;  %s3215_s8 = inlined_call_operand.vmem [shape: f32[4,38,18], index: 8, kind: input, shape index: {}]   ;;  %s3216_s9 = inlined_call_operand.vmem [shape: f32[8,12], index: 9, kind: input, shape index: {}]   ;;  %s3217_s10 = inlined_call_operand.vmem [shape: f32[1,12], index: 10, kind: input, shape index: {}]   ;;  %s3218_s11 = inlined_call_operand.vmem [shape: f32[2,38,12], index: 11, kind: output, shape index: {}]  }
   0x1 LB: > { %s2164_s18 = sadd.s32 4294967295, %s2700_s17   ;;  %p2168_p0 = scmp.ge.s32.totalorder %s2700_s17, 1  ;;  %s2700_s17 = sphi %s2765_s17, %s21_s17  }
   0x2   : > { %p336_p1 = scmp.lt.s32.totalorder %s2700_s17, 3 }
   0x4   : > { %p337_p2 = pnand %p2168_p0, %p336_p1 }
   0x5   : > { %v385_v0 = vld [vmem:[%s3208_s1] sm:$0xff] (!%p337_p2)  ;;  %v386_v1 = vld [vmem:[%s3208_s1 + $0x8] sm:$0xff] (!%p337_p2)  ;;  %v387_v2 = vld [vmem:[%s3208_s1 + $0x10] sm:$0xff] (!%p337_p2)  ;;  %v2702_v3 = vmov (!%p337_p2), 0.0|0.0   ;;  %vm2703_vm0 = vmmov (!%p337_p2), 0   ;;  %v2704_v6 = vmov (!%p337_p2), 0.0  }
   0x6   : > { %340 = sbr.rel (%p337_p2) target bundleno = 1818 (0x71a), region = 64  ;;  %2628 = vmatprep.subr.bf16.mxu0 (!%p337_p2), %v2702_v3  ;;  %v2629_v4 = vpack.c.bf16 (!%p337_p2), %v386_v1, %v385_v0  ;;  %v388_v5 = vld [vmem:[%s3208_s1 + $0x18] sm:$0xff] (!%p337_p2)  ;;  %2384 = vmatprep.mubr.msk.f32.mxu0 (!%p337_p2), %vm2703_vm0, %v2704_v6  ;;  %p375_p3 = scmp.lt.s32.totalorder (!%p337_p2), %s2164_s18, 1  ;;  %v471_v7 = vld [vmem:[%s3210_s3] sm:$0xff] (!%p337_p2)  ;;  %v472_v8 = vld [vmem:[%s3210_s3 + $0x8] sm:$0xff] (!%p337_p2)  ;;  %vm396_vm1 = vcmask (!%p337_p2), 261120  }
   0x7   : > { %2634 = vmatprep.subr.bf16.mxu1 (!%p337_p2), %v2702_v3  ;;  %v2635_v9 = vpack.c.bf16 (!%p337_p2), %v472_v8, %v471_v7  ;;  %2395 = vmatprep.mubr.msk.f32.mxu1 (!%p337_p2), %vm2703_vm0, %v2704_v6  ;;  %v2632_v10 = vpack.c.bf16 (!%p337_p2), %v388_v5, %v387_v2  ;;  %v2174_v11 = vld [vmem:[%s3210_s3 + $0x20] sm:$0xff] (!%p337_p2)  ;;  %v2175_v12 = vld [vmem:[%s3210_s3 + $0x28] sm:$0xff] (!%p337_p2)  ;;  %v473_v15 = vld [vmem:[%s3210_s3 + $0x10] sm:$0xff] (!%p337_p2)  ;;  %vm630_vm2 = vcmask (!%p337_p2), 64512   ;;  %vm1166_vm3 = vcmask (!%p337_p2), 130048  }
   0x8   : > { %2630 = vmatpush3.bf16.msra.mxu0 (!%p337_p2), %v2629_v4  ;;  %v2641_v14 = vpack.c.bf16 (!%p337_p2), %v2175_v12, %v2174_v11  ;;  %v474_v16 = vld [vmem:[%s3210_s3 + $0x18] sm:$0xff] (!%p337_p2)  ;;  %v2176_v17 = vld [vmem:[%s3210_s3 + $0x30] sm:$0xff] (!%p337_p2)  ;;  %v2171_v21 = vld [vmem:[%s3209_s2] ss:$0 sm:$0xff] (!%p337_p2)  ;;  %vm1366_vm4 = vcmask (!%p337_p2), 1041408   ;;  %vm1350_vm5 = vcmask (!%p337_p2), 146432  }
   0x9   : > { %2631 = vmatprep.subr.bf16.mxu0 (!%p337_p2), %v2702_v3  ;;  %2636 = vmatpush3.bf16.msra.mxu1 (!%p337_p2), %v2635_v9  ;;  %v2638_v18 = vpack.c.bf16 (!%p337_p2), %v474_v16, %v473_v15  ;;  %v2177_v19 = vld [vmem:[%s3210_s3 + $0x38] sm:$0xff] (!%p337_p2)  ;;  %v2188_v26 = vld [vmem:[%s3210_s3 + $0x40] sm:$0xff] (!%p337_p2)  ;;  %v2189_v27 = vld [vmem:[%s3210_s3 + $0x48] sm:$0xff] (!%p337_p2)  ;;  %vm2102_vm6 = vcmask (!%p337_p2), 97280   ;;  %vm2107_vm7 = vcmask (!%p337_p2), 95232  }
   0xa   : > { %2637 = vmatprep.subr.bf16.mxu1 (!%p337_p2), %v2702_v3  ;;  %v2644_v20 = vpack.c.bf16 (!%p337_p2), %v2177_v19, %v2176_v17  ;;  %v2199_v28 = vld [vmem:[%s3210_s3 + $0x60] sm:$0xff] (!%p337_p2)  ;;  %v2200_v29 = vld [vmem:[%s3210_s3 + $0x68] sm:$0xff] (!%p337_p2)  ;;  %v2179_v30 = vld [vmem:[%s3212_s5 + $0x18] sm:$0xff] (!%p337_p2)  ;;  %v2647_v36 = vpack.c.bf16 (!%p337_p2), %v2189_v27, %v2188_v26 }
   0xb   : > { %v548_v31 = vld [vmem:[%s3212_s5] sm:$0xff] (!%p337_p2)  ;;  %v2653_v37 = vpack.c.bf16 (!%p337_p2), %v2200_v29, %v2199_v28  ;;  %v2190_v38 = vld [vmem:[%s3210_s3 + $0x50] sm:$0xff] (!%p337_p2)  ;;  %v2191_v39 = vld [vmem:[%s3210_s3 + $0x58] sm:$0xff] (!%p337_p2) }
   0xc   : > { %2633 = vmatpush3.bf16.msra.mxu0 (!%p337_p2), %v2632_v10  ;;  %v2201_v40 = vld [vmem:[%s3210_s3 + $0x70] sm:$0xff] (!%p337_p2)  ;;  %v2202_v41 = vld [vmem:[%s3210_s3 + $0x78] sm:$0xff] (!%p337_p2)  ;;  %v2180_v42 = vld [vmem:[%s3212_s5 + $0x20] sm:$0xff] (!%p337_p2)  ;;  %v2650_v44 = vpack.c.bf16 (!%p337_p2), %v2191_v39, %v2190_v38 }
   0xd   : > { %s3220_s18 = smov (!%p375_p3, %s2164_s18), 1  ;;  %2640 = vmatprep.subr.bf16.mxu0 %v2702_v3  ;;  %2639 = vmatpush3.bf16.msra.mxu1 %v2638_v18  ;;  %v549_v43 = vld [vmem:[%s3212_s5 + $0x8] sm:$0xff]  ;;  %v2656_v45 = vpack.c.bf16 %v2202_v41, %v2201_v40  ;;  %v550_v47 = vld [vmem:[%s3212_s5 + $0x10] sm:$0x3]  ;;  %v2194_v7 = vld [vmem:[%s3212_s5 + $0x38] sm:$0xff] }
   0xe   : > { %s2169_s16 = sshll.u32 %s3220_s18, 3  ;;  %2409 = vmatprep.subr.mxu1 %v2704_v6  ;;  %v2181_v46 = vld [vmem:[%s3212_s5 + $0x28] sm:$0x3]  ;;  %v2193_v63 = vld [vmem:[%s3212_s5 + $0x30] sm:$0xff]  ;;  %v2195_v9 = vld [vmem:[%s3212_s5 + $0x40] sm:$0x3] }
   0xf   : > { %s378_s21 = scalar_lea.vmem %s3207_s0, %s2169_s16  ;;  %v2204_v0 = vld [vmem:[%s3212_s5 + $0x48] sm:$0xff]  ;;  %v2205_v8 = vld [vmem:[%s3212_s5 + $0x50] sm:$0xff]  ;;  %v2206_v10 = vld [vmem:[%s3212_s5 + $0x58] sm:$0x3]  ;;  %s2682_s13 = smul.u32 40, %s3220_s18 }
  0x10   : > { %v384_v13 = vld [vmem:[%s378_s21] sm:$0xff]  ;;  %v2214_v11 = vld [vmem:[%s3213_s6 + $0x10] sm:$0xff]  ;;  %v2215_v12 = vld [vmem:[%s3213_s6 + $0x18] sm:$0xff] }
  0x11   : > { %2385 = vmatmul.mubr.msk.f32.vlgmr.msra.gmra.mrb[0].mxu0 %vm396_vm1, %v384_v13  ;;  %v2662_v13 = vpack.c.bf16 %v2215_v12, %v2214_v11  ;;  %v1165_v15 = vld [vmem:[%s3213_s6 + $0x8] sm:$0xff]  ;;  %s383_s20 = scalar_lea.vmem %s3218_s11, %s2682_s13 }
  0x12   : > { %2642 = vmatpush3.bf16.msra.mxu0 %v2641_v14  ;;  %2406 = vmatprep.mubr.msk.f32.mxu0 %vm2703_vm0, %v2704_v6  ;;  %v1164_v14 = vld [vmem:[%s3213_s6] sm:$0xff] }
  0x13   : > { %2643 = vmatprep.subr.bf16.mxu0 %v2702_v3  ;;  %v2659_v16 = vpack.c.bf16 %v1165_v15, %v1164_v14 }
  0x16   : > { %2645 = vmatpush3.bf16.msra.mxu0 %v2644_v20 }
  0x17   : > { %2420 = vmatprep.subr.mxu0 %v2704_v6 }
  0xe4   : > { %v466_v22 = vpop.f32.mrb[0].mxu0 }
  0xe5   : > { %v467_v23 = vadd.f32 %v2171_v21, %v466_v22  ;;  %v2386_v24 = vpop.f32.mrb[1].mxu0  ;;  %v2210_v22 = vld [vmem:[%s3211_s4] ss:$0 sm:$0xff] }
  0xe7   : > { %v470_v25 = vmax.f32 %v467_v23, 0.0 }
  0xe9   : > { %2396 = vmatmul.mubr.msk.f32.vlgmr.msra.gmra.mrb[0].mxu1 %vm396_vm1, %v470_v25  ;;  %2407 = vmatmul.mubr.msk.f32.vlgmr.msra.gmra.mrb[2].mxu0 %vm396_vm1, %v470_v25 }
  0xea   : > { %2411 = vmatprep.mubr.msk.f32.mxu1 %vm2703_vm0, %v2704_v6  ;;  %2422 = vmatprep.mubr.msk.f32.mxu0 %vm2703_vm0, %v2704_v6 }
 0x1bc   : > { %v544_v32 = vpop.f32.mrb[0].mxu1  ;;  %v622_v33 = vpop.f32.mrb[2].mxu0 }
 0x1bd   : > { %v2397_v34 = vpop.f32.mrb[1].mxu1  ;;  %v2408_v35 = vpop.f32.mrb[3].mxu0  ;;  %2410 = vmatpush3.msra.mxu1 %v622_v33  ;;  %2421 = vmatpush3.msra.mxu0 %v544_v32 }
 0x1be   : > { %2412 = vmatmul.mubr.msk.f32.vlgmr.msra.gmra.mrb[2].mxu1 %vm630_vm2, %v2179_v30  ;;  %2423 = vmatmul.mubr.msk.f32.vlgmr.msra.gmra.mrb[4].mxu0 %vm630_vm2, %v548_v31 }
 0x1bf   : > { %2414 = vmatprep.mubr.msk.f32.mxu1 %vm2703_vm0, %v2704_v6  ;;  %2425 = vmatprep.mubr.msk.f32.mxu0 %vm2703_vm0, %v2704_v6 }
 0x1c0   : > { %2646 = vmatprep.subr.bf16.mxu1 %v2702_v3  ;;  %2652 = vmatprep.subr.bf16.mxu0 %v2702_v3 }
 0x1c1   : > { %2648 = vmatpush3.bf16.msra.mxu1 %v2647_v36  ;;  %2654 = vmatpush3.bf16.msra.mxu0 %v2653_v37 }
 0x1c2   : > { %2415 = vmatmul.mubr.msk.f32.gmra.mrb[4].mxu1 %vm630_vm2, %v2180_v42  ;;  %2426 = vmatmul.mubr.msk.f32.gmra.mrb[6].mxu0 %vm630_vm2, %v549_v43 }
 0x1c3   : > { %2417 = vmatprep.mubr.msk.f32.mxu1 %vm2703_vm0, %v2704_v6  ;;  %2428 = vmatprep.mubr.msk.f32.mxu0 %vm2703_vm0, %v2704_v6 }
 0x1c4   : > { %2649 = vmatprep.subr.bf16.mxu1 %v2702_v3  ;;  %2655 = vmatprep.subr.bf16.mxu0 %v2702_v3 }
 0x1c5   : > { %2651 = vmatpush3.bf16.msra.mxu1 %v2650_v44  ;;  %2657 = vmatpush3.bf16.msra.mxu0 %v2656_v45 }
 0x1c6   : > { %2418 = vmatmul.mubr.msk.f32.gmra.mrb[6].mxu1 %vm630_vm2, %v2181_v46  ;;  %2429 = vmatmul.mubr.msk.f32.gmra.mrb[8].mxu0 %vm630_vm2, %v550_v47 }
 0x1c7   : > { %2439 = vmatprep.mubr.msk.f32.mxu1 %vm2703_vm0, %v2704_v6  ;;  %2461 = vmatprep.mubr.msk.f32.mxu0 %vm2703_vm0, %v2704_v6 }
 0x1c8   : > { %2442 = vmatprep.subr.mxu1 %v2704_v6  ;;  %2464 = vmatprep.subr.mxu0 %v2704_v6 }
 0x1ca   : > { %2440 = vmatmul.mubr.msk.f32.vlgmr.msra.gmra.mrb[8].mxu1 %vm396_vm1, %v470_v25  ;;  %2462 = vmatmul.mubr.msk.f32.vlgmr.msra.gmra.mrb[10].mxu0 %vm396_vm1, %v470_v25 }
 0x1cb   : > { %2444 = vmatprep.mubr.msk.f32.mxu1 %vm2703_vm0, %v2704_v6  ;;  %2466 = vmatprep.mubr.msk.f32.mxu0 %vm2703_vm0, %v2704_v6 }
 0x291   : > { %v706_v48 = vpop.f32.mrb[2].mxu1  ;;  %v795_v49 = vpop.f32.mrb[4].mxu0 }
 0x292   : > { %v796_v50 = vadd.f32 %v795_v49, %v706_v48  ;;  %v2413_v51 = vpop.f32.mrb[3].mxu1  ;;  %v2424_v52 = vpop.f32.mrb[5].mxu0 }
 0x295   : > { %v711_v53 = vpop.f32.mrb[4].mxu1  ;;  %v800_v54 = vpop.f32.mrb[6].mxu0 }
 0x296   : > { %v801_v55 = vadd.f32 %v800_v54, %v711_v53  ;;  %v2416_v56 = vpop.f32.mrb[5].mxu1  ;;  %v2427_v57 = vpop.f32.mrb[7].mxu0  ;;  %v2236_v54 = vld [vmem:[%s3213_s6 + $0x20] sm:$0xff] }
 0x299   : > { %v716_v58 = vpop.f32.mrb[6].mxu1  ;;  %v805_v59 = vpop.f32.mrb[8].mxu0 }
 0x29a   : > { %v806_v60 = vadd.f32 %v805_v59, %v716_v58  ;;  %v2419_v61 = vpop.f32.mrb[7].mxu1  ;;  %v2430_v62 = vpop.f32.mrb[9].mxu0  ;;  %v2219_v58 = vld [vmem:[%s3215_s8 + $0x28] sm:$0xff]  ;;  %v1256_v59 = vld [vmem:[%s3215_s8] sm:$0xff] }
 0x29b   : > { %v2220_v61 = vld [vmem:[%s3215_s8 + $0x30] sm:$0xff]  ;;  %v1257_v62 = vld [vmem:[%s3215_s8 + $0x8] sm:$0xff] }
 0x29d   : > { %v880_v1 = vpop.f32.mrb[8].mxu1  ;;  %v1051_v2 = vpop.f32.mrb[10].mxu0 }
 0x29e   : > { %v2441_v4 = vpop.f32.mrb[9].mxu1  ;;  %2443 = vmatpush3.msra.mxu1 %v880_v1  ;;  %v2463_v5 = vpop.f32.mrb[11].mxu0  ;;  %2465 = vmatpush3.msra.mxu0 %v1051_v2  ;;  %v2222_v1 = vld [vmem:[%s3215_s8 + $0x40] sm:$0xff]  ;;  %v1259_v2 = vld [vmem:[%s3215_s8 + $0x18] sm:$0xff] }
 0x29f   : > { %2445 = vmatmul.mubr.msk.f32.vlgmr.msra.gmra.mrb[10].mxu1 %vm630_vm2, %v2193_v63  ;;  %2467 = vmatmul.mubr.msk.f32.vlgmr.msra.gmra.mrb[12].mxu0 %vm630_vm2, %v2204_v0  ;;  %v2221_v63 = vld [vmem:[%s3215_s8 + $0x38] sm:$0xff]  ;;  %v1258_v0 = vld [vmem:[%s3215_s8 + $0x10] sm:$0xff]  ;;  %v2223_v4 = vld [vmem:[%s3215_s8 + $0x48] sm:$0x3f] }
 0x2a0   : > { %2447 = vmatprep.mubr.msk.f32.mxu1 %vm2703_vm0, %v2704_v6  ;;  %2469 = vmatprep.mubr.msk.f32.mxu0 %vm2703_vm0, %v2704_v6  ;;  %v1260_v5 = vld [vmem:[%s3215_s8 + $0x20] sm:$0x3f] }
 0x2a1   : > { %2661 = vmatprep.subr.bf16.mxu0 %v2702_v3  ;;  %2658 = vmatprep.subr.bf16.mxu1 %v2702_v3 }
 0x2a2   : > { %2663 = vmatpush3.bf16.msra.mxu0 %v2662_v13  ;;  %2660 = vmatpush3.bf16.msra.mxu1 %v2659_v16 }
 0x2a3   : > { %2448 = vmatmul.mubr.msk.f32.gmra.mrb[12].mxu1 %vm630_vm2, %v2194_v7  ;;  %2470 = vmatmul.mubr.msk.f32.gmra.mrb[14].mxu0 %vm630_vm2, %v2205_v8  ;;  %v2252_v7 = vld [vmem:[%s3213_s6 + $0x30] sm:$0xff]  ;;  %v2253_v8 = vld [vmem:[%s3213_s6 + $0x38] sm:$0xff] }
 0x2a4   : > { %2450 = vmatprep.mubr.msk.f32.mxu1 %vm2703_vm0, %v2704_v6  ;;  %2472 = vmatprep.mubr.msk.f32.mxu0 %vm2703_vm0, %v2704_v6 }
 0x2a5   : > { %2667 = vmatprep.subr.bf16.mxu0 %v2702_v3  ;;  %2664 = vmatprep.subr.bf16.mxu1 %v2702_v3 }
 0x2a7   : > { %2451 = vmatmul.mubr.msk.f32.gmra.mrb[14].mxu1 %vm630_vm2, %v2195_v9  ;;  %2473 = vmatmul.mubr.msk.f32.gmra.mrb[16].mxu0 %vm630_vm2, %v2206_v10  ;;  %v2677_v9 = vpack.c.bf16 %v2253_v8, %v2252_v7  ;;  %v2268_v8 = vld [vmem:[%s3214_s7] ss:$0 sm:$0xff] }
 0x2a8   : > { %2479 = vmatprep.mubr.msk.f32.mxu1 %vm2703_vm0, %v2704_v6  ;;  %2492 = vmatprep.mubr.msk.f32.mxu0 %vm2703_vm0, %v2704_v6 }
 0x372   : > { %v963_v17 = vpop.f32.mrb[10].mxu1  ;;  %v1134_v18 = vpop.f32.mrb[12].mxu0 }
 0x373   : > { %v977_v19 = vadd.f32 %v963_v17, %v796_v50  ;;  %v2446_v20 = vpop.f32.mrb[11].mxu1  ;;  %v2468_v21 = vpop.f32.mrb[13].mxu0 }
 0x375   : > { %v1148_v23 = vadd.f32 %v1134_v18, %v977_v19 }
 0x376   : > { %v968_v24 = vpop.f32.mrb[12].mxu1  ;;  %v1139_v25 = vpop.f32.mrb[14].mxu0 }
 0x377   : > { %v1158_v26 = vadd.f32 %v2210_v22, %v1148_v23  ;;  %v978_v27 = vadd.f32 %v968_v24, %v801_v55  ;;  %v2449_v28 = vpop.f32.mrb[13].mxu1  ;;  %v2471_v29 = vpop.f32.mrb[15].mxu0  ;;  %v2237_v55 = vld [vmem:[%s3213_s6 + $0x28] sm:$0xff] }
 0x379   : > { %v2966_v30 = vmax.f32 %v1158_v26, 0.0  ;;  %v1149_v31 = vadd.f32 %v1139_v25, %v978_v27 }
 0x37a   : > { %v973_v32 = vpop.f32.mrb[14].mxu1  ;;  %v1144_v33 = vpop.f32.mrb[16].mxu0 }
 0x37b   : > { %v1159_v34 = vadd.f32 %v2210_v22, %v1149_v31  ;;  %v979_v35 = vadd.f32 %v973_v32, %v806_v60  ;;  %2480 = vmatmul.mubr.msk.f32.vlgmr.msra.gmra.mrb[16].mxu1 %vm1166_vm3, %v2966_v30  ;;  %2493 = vmatmul.mubr.msk.f32.vlgmr.msra.gmra.mrb[18].mxu0 %vm1166_vm3, %v2966_v30  ;;  %v2452_v36 = vpop.f32.mrb[15].mxu1  ;;  %v2474_v37 = vpop.f32.mrb[17].mxu0  ;;  %v2671_v60 = vpack.c.bf16 %v2237_v55, %v2236_v54  ;;  %v2258_v54 = vld [vmem:[%s3215_s8 + $0x80] sm:$0xff]  ;;  %v2259_v55 = vld [vmem:[%s3215_s8 + $0x88] sm:$0xff] }
 0x37c   : > { %2482 = vmatprep.mubr.msk.f32.mxu1 %vm2703_vm0, %v2704_v6  ;;  %2495 = vmatprep.mubr.msk.f32.mxu0 %vm2703_vm0, %v2704_v6 }
 0x37d   : > { %v2976_v38 = vmax.f32 %v1159_v34, 0.0  ;;  %v1150_v39 = vadd.f32 %v1144_v33, %v979_v35 }
 0x37f   : > { %v1160_v40 = vadd.f32 %v2210_v22, %v1150_v39  ;;  %2483 = vmatmul.mubr.msk.f32.gmra.mrb[18].mxu1 %vm1166_vm3, %v2976_v38  ;;  %2496 = vmatmul.mubr.msk.f32.gmra.mrb[20].mxu0 %vm1166_vm3, %v2976_v38 }
 0x380   : > { %2485 = vmatprep.mubr.msk.f32.mxu1 %vm2703_vm0, %v2704_v6  ;;  %2498 = vmatprep.mubr.msk.f32.mxu0 %vm2703_vm0, %v2704_v6 }
 0x381   : > { %v2986_v41 = vmax.f32 %v1160_v40, 0.0 }
 0x383   : > { %2486 = vmatmul.mubr.msk.f32.gmra.mrb[20].mxu1 %vm1166_vm3, %v2986_v41  ;;  %2499 = vmatmul.mubr.msk.f32.gmra.mrb[22].mxu0 %vm1166_vm3, %v2986_v41 }
 0x384   : > { %2507 = vmatprep.mubr.msk.f32.mxu1 %vm2703_vm0, %v2704_v6  ;;  %2528 = vmatprep.mubr.msk.f32.mxu0 %vm2703_vm0, %v2704_v6 }
 0x44e   : > { %v1242_v42 = vpop.f32.mrb[16].mxu1  ;;  %v1330_v43 = vpop.f32.mrb[18].mxu0 }
 0x44f   : > { %v2481_v44 = vpop.f32.mrb[17].mxu1  ;;  %v2494_v45 = vpop.f32.mrb[19].mxu0 }
 0x450   : > { %v2242_v44 = vld [vmem:[%s3215_s8 + $0x58] sm:$0xff] }
 0x452   : > { %v1247_v46 = vpop.f32.mrb[18].mxu1  ;;  %v1335_v47 = vpop.f32.mrb[20].mxu0 }
 0x453   : > { %v2668_v48 = vpack.c.bf16 %v1247_v46, %v1242_v42  ;;  %v2665_v49 = vpack.c.bf16 %v1335_v47, %v1330_v43  ;;  %v2484_v50 = vpop.f32.mrb[19].mxu1  ;;  %v2497_v51 = vpop.f32.mrb[21].mxu0 }
 0x454   : > { %v2244_v51 = vld [vmem:[%s3215_s8 + $0x68] sm:$0xff] }
 0x455   : > { %2666 = vmatpush3.bf16.msra.mxu1 %v2665_v49  ;;  %2669 = vmatpush3.bf16.msra.mxu0 %v2668_v48  ;;  %v2243_v48 = vld [vmem:[%s3215_s8 + $0x60] sm:$0xff] }
 0x456   : > { %v1252_v52 = vpop.f32.mrb[20].mxu1  ;;  %v1340_v53 = vpop.f32.mrb[22].mxu0  ;;  %2505 = vmatprep.subr.mxu1 %v2704_v6  ;;  %2526 = vmatprep.subr.mxu0 %v2704_v6 }
 0x457   : > { %v2487_v56 = vpop.f32.mrb[21].mxu1  ;;  %v2500_v57 = vpop.f32.mrb[23].mxu0 }
 0x458   : > { %v2260_v56 = vld [vmem:[%s3215_s8 + $0x90] sm:$0xff]  ;;  %v2261_v57 = vld [vmem:[%s3215_s8 + $0x98] sm:$0x3f] }
 0x459   : > { %2506 = vmatpush3.msk.msra.mxu1 %vm1366_vm4, %v1340_v53  ;;  %2527 = vmatpush3.msk.msra.mxu0 %vm1366_vm4, %v1252_v52  ;;  %v2257_v52 = vld [vmem:[%s3215_s8 + $0x78] sm:$0xff]  ;;  %v2245_v53 = vld [vmem:[%s3215_s8 + $0x70] sm:$0x3f] }
 0x45a   : > { %2508 = vmatmul.mubr.msk.f32.vlgmr.msra.gmra.mrb[22].mxu1 %vm1350_vm5, %v2219_v58  ;;  %2529 = vmatmul.mubr.msk.f32.vlgmr.msra.gmra.mrb[24].mxu0 %vm1350_vm5, %v1256_v59  ;;  %v1989_v58 = vld [vmem:[%s3216_s9] sm:$0xff] }
 0x45b   : > { %2510 = vmatprep.mubr.msk.f32.mxu1 %vm2703_vm0, %v2704_v6  ;;  %2531 = vmatprep.mubr.msk.f32.mxu0 %vm2703_vm0, %v2704_v6 }
 0x45c   : > { %2670 = vmatprep.subr.bf16.mxu1 %v2702_v3  ;;  %2673 = vmatprep.subr.bf16.mxu0 %v2702_v3 }
 0x45d   : > { %2672 = vmatpush3.bf16.msra.mxu1 %v2671_v60 }
 0x45e   : > { %2511 = vmatmul.mubr.msk.f32.gmra.mrb[24].mxu1 %vm1350_vm5, %v2220_v61  ;;  %2532 = vmatmul.mubr.msk.f32.gmra.mrb[26].mxu0 %vm1350_vm5, %v1257_v62 }
 0x45f   : > { %2513 = vmatprep.mubr.msk.f32.mxu1 %vm2703_vm0, %v2704_v6  ;;  %2534 = vmatprep.mubr.msk.f32.mxu0 %vm2703_vm0, %v2704_v6 }
 0x460   : > { %2676 = vmatprep.subr.bf16.mxu1 %v2702_v3 }
 0x462   : > { %2514 = vmatmul.mubr.msk.f32.gmra.mrb[26].mxu1 %vm1350_vm5, %v2221_v63  ;;  %2535 = vmatmul.mubr.msk.f32.gmra.mrb[28].mxu0 %vm1350_vm5, %v1258_v0 }
 0x463   : > { %2516 = vmatprep.mubr.msk.f32.mxu1 %vm2703_vm0, %v2704_v6  ;;  %2537 = vmatprep.mubr.msk.f32.mxu0 %vm2703_vm0, %v2704_v6 }
 0x466   : > { %2517 = vmatmul.mubr.msk.f32.gmra.mrb[28].mxu1 %vm1350_vm5, %v2222_v1  ;;  %2538 = vmatmul.mubr.msk.f32.gmra.mrb[30].mxu0 %vm1350_vm5, %v1259_v2 }
 0x467   : > { %2519 = vmatprep.mubr.msk.f32.mxu1 %vm2703_vm0, %v2704_v6  ;;  %2540 = vmatprep.mubr.msk.f32.mxu0 %vm2703_vm0, %v2704_v6 }
 0x46a   : > { %2520 = vmatmul.mubr.msk.f32.gmra.mrb[30].mxu1 %vm1350_vm5, %v2223_v4  ;;  %2541 = vmatmul.mubr.msk.f32.gmra.mrb[32].mxu0 %vm1350_vm5, %v1260_v5 }
 0x46b   : > { %2547 = vmatprep.mubr.msk.f32.mxu1 %vm2703_vm0, %v2704_v6  ;;  %2562 = vmatprep.mubr.msk.f32.mxu0 %vm2703_vm0, %v2704_v6 }
 0x46e   : > { %2548 = vmatmul.mubr.msk.f32.vlgmr.msra.gmra.mrb[32].mxu1 %vm1166_vm3, %v2966_v30 }
 0x46f   : > { %2550 = vmatprep.mubr.msk.f32.mxu1 %vm2703_vm0, %v2704_v6  ;;  %2678 = vmatpush3.bf16.msra.mxu1 %v2677_v9 }
 0x470   : > { %2679 = vmatprep.subr.bf16.mxu1 %v2702_v3 }
 0x472   : > { %2551 = vmatmul.mubr.msk.f32.gmra.mrb[34].mxu1 %vm1166_vm3, %v2976_v38 }
 0x473   : > { %2553 = vmatprep.mubr.msk.f32.mxu1 %vm2703_vm0, %v2704_v6 }
 0x476   : > { %2554 = vmatmul.mubr.msk.f32.gmra.mrb[36].mxu1 %vm1166_vm3, %v2986_v41 }
 0x477   : > { %2581 = vmatprep.mubr.msk.f32.mxu1 %vm2703_vm0, %v2704_v6 }
 0x47a   : > { %2582 = vmatmul.mubr.msk.f32.vlgmr.msra.gmra.mrb[38].mxu1 %vm1166_vm3, %v2966_v30 }
 0x47b   : > { %2584 = vmatprep.mubr.msk.f32.mxu1 %vm2703_vm0, %v2704_v6 }
 0x47e   : > { %2585 = vmatmul.mubr.msk.f32.gmra.mrb[40].mxu1 %vm1166_vm3, %v2976_v38 }
 0x47f   : > { %2587 = vmatprep.mubr.msk.f32.mxu1 %vm2703_vm0, %v2704_v6 }
 0x482   : > { %2588 = vmatmul.mubr.msk.f32.gmra.mrb[42].mxu1 %vm1166_vm3, %v2986_v41  ;;  %v2241_v41 = vld [vmem:[%s3215_s8 + $0x50] sm:$0xff] }
 0x483   : > { %2596 = vmatprep.mubr.msk.f32.mxu1 %vm2703_vm0, %v2704_v6 }
 0x52d   : > { %v1436_v3 = vpop.f32.mrb[22].mxu1  ;;  %v1544_v10 = vpop.f32.mrb[24].mxu0 }
 0x52e   : > { %v3100_v11 = vadd.f32 %v1544_v10, %v1436_v3  ;;  %v2509_v12 = vpop.f32.mrb[23].mxu1  ;;  %v2530_v13 = vpop.f32.mrb[25].mxu0 }
 0x531   : > { %v1441_v14 = vpop.f32.mrb[24].mxu1  ;;  %v1549_v15 = vpop.f32.mrb[26].mxu0 }
 0x532   : > { %v3102_v16 = vadd.f32 %v1549_v15, %v1441_v14  ;;  %v2512_v17 = vpop.f32.mrb[25].mxu1  ;;  %v2533_v18 = vpop.f32.mrb[27].mxu0 }
 0x535   : > { %v1446_v19 = vpop.f32.mrb[26].mxu1  ;;  %v1554_v20 = vpop.f32.mrb[28].mxu0 }
 0x536   : > { %v3104_v21 = vadd.f32 %v1554_v20, %v1446_v19  ;;  %v2515_v22 = vpop.f32.mrb[27].mxu1  ;;  %v2536_v23 = vpop.f32.mrb[29].mxu0 }
 0x539   : > { %v1451_v24 = vpop.f32.mrb[28].mxu1  ;;  %v1559_v25 = vpop.f32.mrb[30].mxu0 }
 0x53a   : > { %v3106_v26 = vadd.f32 %v1559_v25, %v1451_v24  ;;  %v2518_v27 = vpop.f32.mrb[29].mxu1  ;;  %v2539_v28 = vpop.f32.mrb[31].mxu0 }
 0x53d   : > { %v1456_v29 = vpop.f32.mrb[30].mxu1  ;;  %v1564_v30 = vpop.f32.mrb[32].mxu0 }
 0x53e   : > { %v3108_v31 = vadd.f32 %v1564_v30, %v1456_v29  ;;  %v2521_v32 = vpop.f32.mrb[31].mxu1  ;;  %v2542_v33 = vpop.f32.mrb[33].mxu0 }
 0x541   : > { %v1637_v34 = vpop.f32.mrb[32].mxu1 }
 0x542   : > { %v2549_v35 = vpop.f32.mrb[33].mxu1 }
 0x545   : > { %v1642_v36 = vpop.f32.mrb[34].mxu1 }
 0x546   : > { %v2674_v37 = vpack.c.bf16 %v1642_v36, %v1637_v34  ;;  %v2552_v38 = vpop.f32.mrb[35].mxu1 }
 0x548   : > { %2675 = vmatpush3.bf16.msra.mxu0 %v2674_v37  ;;  %v2269_v37 = vld [vmem:[%s3217_s10] ss:$0 sm:$0xff] }
 0x549   : > { %v1647_v39 = vpop.f32.mrb[36].mxu1  ;;  %2560 = vmatprep.subr.mxu0 %v2704_v6 }
 0x54a   : > { %v2555_v40 = vpop.f32.mrb[37].mxu1 }
 0x54c   : > { %2561 = vmatpush3.msk.msra.mxu0 %vm1366_vm4, %v1647_v39 }
 0x54d   : > { %2563 = vmatmul.mubr.msk.f32.vlgmr.msra.gmra.mrb[34].mxu0 %vm1350_vm5, %v2241_v41  ;;  %v1839_v42 = vpop.f32.mrb[38].mxu1  ;;  %2611 = vmatprep.subr.mxu0 %v2704_v6 }
 0x54e   : > { %v2583_v43 = vpop.f32.mrb[39].mxu1  ;;  %2565 = vmatprep.mubr.msk.f32.mxu0 %vm2703_vm0, %v2704_v6  ;;  %2612 = vmatpush3.msra.mxu0 %v1989_v58 }
 0x551   : > { %2566 = vmatmul.mubr.msk.f32.gmra.mrb[36].mxu0 %vm1350_vm5, %v2242_v44  ;;  %v1844_v45 = vpop.f32.mrb[40].mxu1 }
 0x552   : > { %v2680_v46 = vpack.c.bf16 %v1844_v45, %v1839_v42  ;;  %v2586_v47 = vpop.f32.mrb[41].mxu1  ;;  %2568 = vmatprep.mubr.msk.f32.mxu0 %vm2703_vm0, %v2704_v6 }
 0x554   : > { %2681 = vmatpush3.bf16.msra.mxu1 %v2680_v46 }
 0x555   : > { %2569 = vmatmul.mubr.msk.f32.gmra.mrb[38].mxu0 %vm1350_vm5, %v2243_v48  ;;  %v1849_v49 = vpop.f32.mrb[42].mxu1  ;;  %2594 = vmatprep.subr.mxu1 %v2704_v6 }
 0x556   : > { %v2589_v50 = vpop.f32.mrb[43].mxu1  ;;  %2571 = vmatprep.mubr.msk.f32.mxu0 %vm2703_vm0, %v2704_v6 }
 0x558   : > { %2595 = vmatpush3.msk.msra.mxu1 %vm1366_vm4, %v1849_v49 }
 0x559   : > { %2572 = vmatmul.mubr.msk.f32.gmra.mrb[40].mxu0 %vm1350_vm5, %v2244_v51  ;;  %2597 = vmatmul.mubr.msk.f32.vlgmr.msra.gmra.mrb[44].mxu1 %vm1350_vm5, %v2257_v52 }
 0x55a   : > { %2574 = vmatprep.mubr.msk.f32.mxu0 %vm2703_vm0, %v2704_v6  ;;  %2599 = vmatprep.mubr.msk.f32.mxu1 %vm2703_vm0, %v2704_v6 }
 0x55d   : > { %2575 = vmatmul.mubr.msk.f32.gmra.mrb[42].mxu0 %vm1350_vm5, %v2245_v53  ;;  %2600 = vmatmul.mubr.msk.f32.gmra.mrb[46].mxu1 %vm1350_vm5, %v2258_v54 }
 0x55e   : > { %2602 = vmatprep.mubr.msk.f32.mxu1 %vm2703_vm0, %v2704_v6  ;;  %2613 = vmatprep.mubr.msk.f32.mxu0 %vm2703_vm0, %v2704_v6 }
 0x561   : > { %2603 = vmatmul.mubr.msk.f32.gmra.mrb[48].mxu1 %vm1350_vm5, %v2259_v55 }
 0x562   : > { %2605 = vmatprep.mubr.msk.f32.mxu1 %vm2703_vm0, %v2704_v6 }
 0x565   : > { %2606 = vmatmul.mubr.msk.f32.gmra.mrb[50].mxu1 %vm1350_vm5, %v2260_v56 }
 0x566   : > { %2608 = vmatprep.mubr.msk.f32.mxu1 %vm2703_vm0, %v2704_v6 }
 0x569   : > { %2609 = vmatmul.mubr.msk.f32.gmra.mrb[52].mxu1 %vm1350_vm5, %v2261_v57 }
 0x620   : > { %v1741_v59 = vpop.f32.mrb[34].mxu0 }
 0x621   : > { %v1765_v60 = vadd.f32 %v1741_v59, %v3100_v11  ;;  %v2564_v61 = vpop.f32.mrb[35].mxu0 }
 0x624   : > { %v1746_v62 = vpop.f32.mrb[36].mxu0 }
 0x625   : > { %v1766_v63 = vadd.f32 %v1746_v62, %v3102_v16  ;;  %v2567_v0 = vpop.f32.mrb[37].mxu0 }
 0x628   : > { %v1751_v1 = vpop.f32.mrb[38].mxu0 }
 0x629   : > { %v1767_v2 = vadd.f32 %v1751_v1, %v3104_v21  ;;  %v2570_v4 = vpop.f32.mrb[39].mxu0 }
 0x62c   : > { %v1756_v5 = vpop.f32.mrb[40].mxu0  ;;  %v1943_v7 = vpop.f32.mrb[44].mxu1 }
 0x62d   : > { %v1768_v9 = vadd.f32 %v1756_v5, %v3106_v26  ;;  %v1967_v3 = vadd.f32 %v1943_v7, %v1765_v60  ;;  %v2573_v10 = vpop.f32.mrb[41].mxu0  ;;  %v2598_v11 = vpop.f32.mrb[45].mxu1 }
 0x62f   : > { %v1979_v12 = vadd.f32 %v2268_v8, %v1967_v3 }
 0x630   : > { %v1761_v13 = vpop.f32.mrb[42].mxu0  ;;  %v1948_v14 = vpop.f32.mrb[46].mxu1 }
 0x631   : > { %v1984_v15 = vmax.f32 %v1979_v12, 0.0  ;;  %v1769_v16 = vadd.f32 %v1761_v13, %v3108_v31  ;;  %v1968_v17 = vadd.f32 %v1948_v14, %v1766_v63  ;;  %v2601_v18 = vpop.f32.mrb[47].mxu1  ;;  %v2576_v19 = vpop.f32.mrb[43].mxu0 }
 0x633   : > { %v1980_v20 = vadd.f32 %v2268_v8, %v1968_v17  ;;  %2614 = vmatmul.mubr.msk.f32.vlgmr.msra.gmra.mrb[44].mxu0 %vm630_vm2, %v1984_v15 }
 0x634   : > { %v1953_v21 = vpop.f32.mrb[48].mxu1  ;;  %2616 = vmatprep.mubr.msk.f32.mxu0 %vm2703_vm0, %v2704_v6 }
 0x635   : > { %v1985_v22 = vmax.f32 %v1980_v20, 0.0  ;;  %v1969_v23 = vadd.f32 %v1953_v21, %v1767_v2  ;;  %v2604_v24 = vpop.f32.mrb[49].mxu1 }
 0x637   : > { %v1981_v25 = vadd.f32 %v2268_v8, %v1969_v23  ;;  %2617 = vmatmul.mubr.msk.f32.gmra.mrb[46].mxu0 %vm630_vm2, %v1985_v22 }
 0x638   : > { %v1958_v26 = vpop.f32.mrb[50].mxu1  ;;  %2619 = vmatprep.mubr.msk.f32.mxu0 %vm2703_vm0, %v2704_v6 }
 0x639   : > { %v1986_v27 = vmax.f32 %v1981_v25, 0.0  ;;  %v1970_v28 = vadd.f32 %v1958_v26, %v1768_v9  ;;  %v2607_v29 = vpop.f32.mrb[51].mxu1 }
 0x63b   : > { %v1982_v30 = vadd.f32 %v2268_v8, %v1970_v28  ;;  %2620 = vmatmul.mubr.msk.f32.gmra.mrb[48].mxu0 %vm630_vm2, %v1986_v27 }
 0x63c   : > { %v1963_v31 = vpop.f32.mrb[52].mxu1  ;;  %2622 = vmatprep.mubr.msk.f32.mxu0 %vm2703_vm0, %v2704_v6 }
 0x63d   : > { %v1987_v32 = vmax.f32 %v1982_v30, 0.0  ;;  %v1971_v33 = vadd.f32 %v1963_v31, %v1769_v16  ;;  %v2610_v34 = vpop.f32.mrb[53].mxu1 }
 0x63f   : > { %v1983_v35 = vadd.f32 %v2268_v8, %v1971_v33  ;;  %2623 = vmatmul.mubr.msk.f32.gmra.mrb[50].mxu0 %vm630_vm2, %v1987_v32 }
 0x640   : > { %2625 = vmatprep.mubr.msk.f32.mxu0 %vm2703_vm0, %v2704_v6 }
 0x641   : > { %v1988_v36 = vmax.f32 %v1983_v35, 0.0 }
 0x643   : > { %2626 = vmatmul.mubr.msk.f32.gmra.mrb[52].mxu0 %vm630_vm2, %v1988_v36 }
 0x706   : > { %v2078_v38 = vpop.f32.mrb[44].mxu0 }
 0x707   : > { %v2079_v39 = vadd.f32 %v2269_v37, %v2078_v38  ;;  %v2615_v40 = vpop.f32.mrb[45].mxu0 }
 0x709   : > { %2103 = vst.msk [vmem:[%s383_s20] sm:$0xff] %vm2102_vm6, %v2079_v39 }
 0x70a   : > { %v2083_v41 = vpop.f32.mrb[46].mxu0 }
 0x70b   : > { %v2084_v42 = vadd.f32 %v2269_v37, %v2083_v41  ;;  %v2618_v6 = vpop.f32.mrb[47].mxu0 }
 0x70d   : > { %2104 = vst.msk [vmem:[%s383_s20 + $0x8] sm:$0xff] %vm2102_vm6, %v2084_v42 }
 0x70e   : > { %v2088_v43 = vpop.f32.mrb[48].mxu0 }
 0x70f   : > { %v2089_v44 = vadd.f32 %v2269_v37, %v2088_v43  ;;  %v2621_v45 = vpop.f32.mrb[49].mxu0 }
 0x711   : > { %2105 = vst.msk [vmem:[%s383_s20 + $0x10] sm:$0xff] %vm2102_vm6, %v2089_v44 }
 0x712   : > { %v2093_v46 = vpop.f32.mrb[50].mxu0 }
 0x713   : > { %v2094_v47 = vadd.f32 %v2269_v37, %v2093_v46  ;;  %v2624_v48 = vpop.f32.mrb[51].mxu0 }
 0x715   : > { %2106 = vst.msk [vmem:[%s383_s20 + $0x18] sm:$0xff] %vm2102_vm6, %v2094_v47 }
 0x716   : > { %v2098_v49 = vpop.f32.mrb[52].mxu0 }
 0x717   : > { %v2099_v50 = vadd.f32 %v2269_v37, %v2098_v49  ;;  %v2627_v51 = vpop.f32.mrb[53].mxu0 }
 0x719   : > { %2108 = vst.msk [vmem:[%s383_s20 + $0x20] sm:$0x3f] %vm2107_vm7, %v2099_v50 }
 0x71a PF: > { %s21_s17 = sadd.s32 1, %s2700_s17  }
 0x71b   : > { %p18_p4 = scmp.ge.s32.totalorder %s21_s17, 4  }
 0x71d   :  { %20 = sbr.rel (!%p18_p4) target bundleno = 1 (0x1), region = 106 }

</bundles_post_ra>
